<compile_context>
chip_gen: v5e
topology: v5e:2x2
jax: 0.10.0
libtpu: 0.0.40
codegen_flags: <defaults>
</compile_context>

<pallas_src>
import functools

import jax
import jax.numpy as jnp
from jax.experimental import pallas as pl
from jax.experimental.pallas import tpu as pltpu


def _round_up(a: int, m: int) -> int:
    return ((a + m - 1) // m) * m


_TB_MAX = 2048   # max rows per grid step (h1/h2 f32 tiles at 2048x128 ~= 1 MiB each)
_TB_MULT = 256   # MXU-friendly tile multiple (also a multiple of v5e's 128)


def _pick_tb(B: int) -> int:
    """Batch-tile selection: single small tile for tiny B, >=2 big tiles otherwise."""
    if B <= _TB_MULT:
        # Latency-dominated regime: one tile, just round up to the 8-sublane minimum.
        return _round_up(B, 8)
    # Throughput regime: >=2 steps (feeds both v7x TensorCores), cap tile size,
    # round to an MXU-friendly multiple while keeping batch padding modest.
    n_steps = max(2, -(-B // _TB_MAX))
    return _round_up(-(-B // n_steps), _TB_MULT)


def dqn_kernel(x_ref, w1_ref, b1_ref, w2_ref, b2_ref, w3_ref, b3_ref, o_ref):
    # Hoist biases once (avoid repeated implicit broadcast materialization).
    b1 = b1_ref[...]            # (1, H)      f32
    b2 = b2_ref[...]            # (1, H)      f32
    b3 = b3_ref[...]            # (1, na_pad) f32

    # layer1 + ReLU: x arrives f32, cast to bf16 here (K = n_obs is tiny).
    x = x_ref[...].astype(jnp.bfloat16)
    h1 = jnp.dot(x, w1_ref[...], preferred_element_type=jnp.float32)
    h1 = jnp.maximum(h1 + b1, 0.0)

    # layer2 + ReLU
    h2 = jnp.dot(h1.astype(jnp.bfloat16), w2_ref[...],
                 preferred_element_type=jnp.float32)
    h2 = jnp.maximum(h2 + b2, 0.0)

    # layer3 (no activation) -> narrow (8-lane) f32 output block, masked store.
    out = jnp.dot(h2.astype(jnp.bfloat16), w3_ref[...],
                  preferred_element_type=jnp.float32)
    o_ref[...] = out + b3


def prepare_dqn_params(params):
    """One-time pad/cast of the weights.

    Call at init and whenever weights change (optimizer / target-net update),
    NOT per forward pass -- this hoists the bf16 casts and output padding off
    the latency-critical act() path.
    """
    bf = jnp.bfloat16
    n_act = params["w3"].shape[1]
    na_pad = _round_up(n_act, 8)   # narrow masked store: 8 lanes, not 128
    return {
        "w1": params["w1"].astype(bf),
        "b1": params["b1"].astype(jnp.float32).reshape(1, -1),
        "w2": params["w2"].astype(bf),
        "b2": params["b2"].astype(jnp.float32).reshape(1, -1),
        "w3": jnp.pad(params["w3"].astype(bf), ((0, 0), (0, na_pad - n_act))),
        "b3": jnp.pad(params["b3"].astype(jnp.float32).reshape(1, -1),
                      ((0, 0), (0, na_pad - n_act))),
    }


@functools.partial(jax.jit, static_argnames=("n_actions",))
def dqn_forward(x, prep, *, n_actions):
    """x: (B, n_obs) f32.  prep: output of prepare_dqn_params.  Returns (B, n_actions) f32."""
    B, n_obs = x.shape
    H = prep["w1"].shape[1]
    na_pad = prep["w3"].shape[1]

    TB = _pick_tb(B)
    B_pad = _round_up(B, TB)
    if B_pad != B:
        # Padded rows produce bias-only junk that is sliced off below.
        x = jnp.pad(x, ((0, B_pad - B), (0, 0)))

    grid = (B_pad // TB,)
    const = lambda shape: pl.BlockSpec(shape, lambda i: (0, 0))  # resident in VMEM

    out = pl.pallas_call(
        dqn_kernel,
        out_shape=jax.ShapeDtypeStruct((B_pad, na_pad), jnp.float32),
        grid=grid,
        in_specs=[
            pl.BlockSpec((TB, n_obs), lambda i: (i, 0)),   # x: tiled over batch
            const((n_obs, H)),                             # w1
            const((1, H)),                                 # b1
            const((H, H)),                                 # w2
            const((1, H)),                                 # b2
            const((H, na_pad)),                            # w3 (8-lane padded)
            const((1, na_pad)),                            # b3 (8-lane padded)
        ],
        out_specs=pl.BlockSpec((TB, na_pad), lambda i: (i, 0)),
        compiler_params=pltpu.CompilerParams(
            dimension_semantics=("parallel",)),
    )(x, prep["w1"], prep["b1"], prep["w2"], prep["b2"], prep["w3"], prep["b3"])

    return out[:B, :n_actions]


def init_dqn_params(key, n_observations, n_actions, hidden=128):
    """Deterministic init mimicking PyTorch nn.Linear (U(-1/sqrt(fan_in), +))."""
    ks = jax.random.split(key, 6)

    def lin(kw, kb, fan_in, fan_out):
        bound = 1.0 / jnp.sqrt(fan_in)
        w = jax.random.uniform(kw, (fan_in, fan_out), jnp.float32, -bound, bound)
        b = jax.random.uniform(kb, (1, fan_out), jnp.float32, -bound, bound)
        return w, b

    w1, b1 = lin(ks[0], ks[1], n_observations, hidden)
    w2, b2 = lin(ks[2], ks[3], hidden, hidden)
    w3, b3 = lin(ks[4], ks[5], hidden, n_actions)
    return {"w1": w1, "b1": b1, "w2": w2, "b2": b2, "w3": w3, "b3": b3}


def dqn_reference(x, p):
    """Reference matching the kernel's numerics (bf16 operands, f32 accumulate).

    Note: bf16 MXU feed differs from a pure-f32 PyTorch DQN; documented choice --
    near-tie Q-values could in principle flip argmax.
    """
    bf = jnp.bfloat16
    h1 = jnp.dot(x.astype(bf), p["w1"].astype(bf),
                 preferred_element_type=jnp.float32) + p["b1"]
    h1 = jnp.maximum(h1, 0.0)
    h2 = jnp.dot(h1.astype(bf), p["w2"].astype(bf),
                 preferred_element_type=jnp.float32) + p["b2"]
    h2 = jnp.maximum(h2, 0.0)
    return jnp.dot(h2.astype(bf), p["w3"].astype(bf),
                   preferred_element_type=jnp.float32) + p["b3"]


if __name__ == "__main__":
    key = jax.random.PRNGKey(0)
    k_x, k_p = jax.random.split(key)

    # Small CartPole-like problem: 4 observations, 2 actions, batch of 8.
    batch, n_obs, n_act = 8, 4, 2
    x = jax.random.normal(k_x, (batch, n_obs), jnp.float32)
    params = init_dqn_params(k_p, n_obs, n_act)
    prep = prepare_dqn_params(params)   # one-time pad/cast, off the hot path

    out = jax.block_until_ready(dqn_forward(x, prep, n_actions=n_act))
    ref = dqn_reference(x, params)

    assert out.shape == (batch, n_act), out.shape
    assert jnp.allclose(out, ref, atol=1e-2, rtol=1e-2), "mismatch vs reference"
    print("KERNEL_OK")
</pallas_src>

<mosaic_0001>
module attributes {stable_mosaic.version = 11 : i64} {
  func.func @dqn_kernel(%arg0: i32, %arg1: memref<8x4xf32, #tpu.memory_space<vmem>>, %arg2: memref<4x128xbf16, #tpu.memory_space<vmem>>, %arg3: memref<1x128xf32, #tpu.memory_space<vmem>>, %arg4: memref<128x128xbf16, #tpu.memory_space<vmem>>, %arg5: memref<1x128xf32, #tpu.memory_space<vmem>>, %arg6: memref<128x8xbf16, #tpu.memory_space<vmem>>, %arg7: memref<1x8xf32, #tpu.memory_space<vmem>>, %arg8: memref<8x8xf32, #tpu.memory_space<vmem>>) attributes {dimension_semantics = [#tpu.dimension_semantics<parallel>], iteration_bounds = array<i64: 1>, scalar_prefetch = 0 : i64, scratch_operands = 0 : i64, tpu.core_type = #tpu.core_type<tc>, window_params = [{transform_indices = @transform_0, window_bounds = array<i64: 8, 4>}, {pipeline_mode = #tpu.pipeline_mode<synchronous>, transform_indices = @transform_1, window_bounds = array<i64: 4, 128>}, {pipeline_mode = #tpu.pipeline_mode<synchronous>, transform_indices = @transform_2, window_bounds = array<i64: 1, 128>}, {pipeline_mode = #tpu.pipeline_mode<synchronous>, transform_indices = @transform_3, window_bounds = array<i64: 128, 128>}, {pipeline_mode = #tpu.pipeline_mode<synchronous>, transform_indices = @transform_4, window_bounds = array<i64: 1, 128>}, {pipeline_mode = #tpu.pipeline_mode<synchronous>, transform_indices = @transform_5, window_bounds = array<i64: 128, 8>}, {pipeline_mode = #tpu.pipeline_mode<synchronous>, transform_indices = @transform_6, window_bounds = array<i64: 1, 8>}, {transform_indices = @transform_7, window_bounds = array<i64: 8, 8>}]} {
    %c0 = arith.constant 0 : index
    %c0_0 = arith.constant 0 : index
    %0 = vector.load %arg3[%c0, %c0_0] : memref<1x128xf32, #tpu.memory_space<vmem>>, vector<1x128xf32>
    %c0_1 = arith.constant 0 : index
    %c0_2 = arith.constant 0 : index
    %1 = vector.load %arg5[%c0_1, %c0_2] : memref<1x128xf32, #tpu.memory_space<vmem>>, vector<1x128xf32>
    %c0_3 = arith.constant 0 : index
    %c0_4 = arith.constant 0 : index
    %2 = vector.load %arg7[%c0_3, %c0_4] : memref<1x8xf32, #tpu.memory_space<vmem>>, vector<1x8xf32>
    %c0_5 = arith.constant 0 : index
    %c0_6 = arith.constant 0 : index
    %3 = vector.load %arg1[%c0_5, %c0_6] : memref<8x4xf32, #tpu.memory_space<vmem>>, vector<8x4xf32>
    %4 = arith.truncf %3 : vector<8x4xf32> to vector<8x4xbf16>
    %c0_7 = arith.constant 0 : index
    %c0_8 = arith.constant 0 : index
    %5 = vector.load %arg2[%c0_7, %c0_8] : memref<4x128xbf16, #tpu.memory_space<vmem>>, vector<4x128xbf16>
    %cst = arith.constant dense<0.000000e+00> : vector<8x128xf32>
    %6 = tpu.matmul %4, %5, %cst {dimension_numbers = #tpu.dot_dimension_numbers<[1], [0], [0], [1], [0, 0, 1, 1], [], []>} : vector<8x4xbf16>, vector<4x128xbf16>, vector<8x128xf32> -> vector<8x128xf32>
    %7 = vector.broadcast %0 : vector<1x128xf32> to vector<8x128xf32>
    %8 = arith.addf %6, %7 : vector<8x128xf32>
    %cst_9 = arith.constant 0.000000e+00 : f32
    %9 = vector.broadcast %cst_9 : f32 to vector<8x128xf32>
    %10 = arith.maximumf %8, %9 : vector<8x128xf32>
    %11 = arith.truncf %10 : vector<8x128xf32> to vector<8x128xbf16>
    %c0_10 = arith.constant 0 : index
    %c0_11 = arith.constant 0 : index
    %12 = vector.load %arg4[%c0_10, %c0_11] : memref<128x128xbf16, #tpu.memory_space<vmem>>, vector<128x128xbf16>
    %cst_12 = arith.constant dense<0.000000e+00> : vector<8x128xf32>
    %13 = tpu.matmul %11, %12, %cst_12 {dimension_numbers = #tpu.dot_dimension_numbers<[1], [0], [0], [1], [0, 0, 1, 1], [], []>} : vector<8x128xbf16>, vector<128x128xbf16>, vector<8x128xf32> -> vector<8x128xf32>
    %14 = vector.broadcast %1 : vector<1x128xf32> to vector<8x128xf32>
    %15 = arith.addf %13, %14 : vector<8x128xf32>
    %cst_13 = arith.constant 0.000000e+00 : f32
    %16 = vector.broadcast %cst_13 : f32 to vector<8x128xf32>
    %17 = arith.maximumf %15, %16 : vector<8x128xf32>
    %18 = arith.truncf %17 : vector<8x128xf32> to vector<8x128xbf16>
    %c0_14 = arith.constant 0 : index
    %c0_15 = arith.constant 0 : index
    %19 = vector.load %arg6[%c0_14, %c0_15] : memref<128x8xbf16, #tpu.memory_space<vmem>>, vector<128x8xbf16>
    %cst_16 = arith.constant dense<0.000000e+00> : vector<8x8xf32>
    %20 = tpu.matmul %18, %19, %cst_16 {dimension_numbers = #tpu.dot_dimension_numbers<[1], [0], [0], [1], [0, 0, 1, 1], [], []>} : vector<8x128xbf16>, vector<128x8xbf16>, vector<8x8xf32> -> vector<8x8xf32>
    %21 = vector.broadcast %2 : vector<1x8xf32> to vector<8x8xf32>
    %22 = arith.addf %20, %21 : vector<8x8xf32>
    %c0_17 = arith.constant 0 : index
    %c0_18 = arith.constant 0 : index
    %23 = vector.load %arg8[%c0_17, %c0_18] : memref<8x8xf32, #tpu.memory_space<vmem>>, vector<8x8xf32>
    tpu.vector_store %arg8[%c0_17, %c0_18], %22 {strides = array<i32>} : memref<8x8xf32, #tpu.memory_space<vmem>>, vector<8x8xf32>,
    return
  }
  func.func @transform_0(%arg0: i32) -> (i32, i32) {
    %c0_i32 = arith.constant 0 : i32
    %c0_i32_0 = arith.constant 0 : i32
    return %arg0, %c0_i32 : i32, i32
  }
  func.func @transform_1(%arg0: i32) -> (i32, i32) {
    %c0_i32 = arith.constant 0 : i32
    %c0_i32_0 = arith.constant 0 : i32
    %c0_i32_1 = arith.constant 0 : i32
    return %c0_i32, %c0_i32_0 : i32, i32
  }
  func.func @transform_2(%arg0: i32) -> (i32, i32) {
    %c0_i32 = arith.constant 0 : i32
    %c0_i32_0 = arith.constant 0 : i32
    %c0_i32_1 = arith.constant 0 : i32
    return %c0_i32, %c0_i32_0 : i32, i32
  }
  func.func @transform_3(%arg0: i32) -> (i32, i32) {
    %c0_i32 = arith.constant 0 : i32
    %c0_i32_0 = arith.constant 0 : i32
    %c0_i32_1 = arith.constant 0 : i32
    return %c0_i32, %c0_i32_0 : i32, i32
  }
  func.func @transform_4(%arg0: i32) -> (i32, i32) {
    %c0_i32 = arith.constant 0 : i32
    %c0_i32_0 = arith.constant 0 : i32
    %c0_i32_1 = arith.constant 0 : i32
    return %c0_i32, %c0_i32_0 : i32, i32
  }
  func.func @transform_5(%arg0: i32) -> (i32, i32) {
    %c0_i32 = arith.constant 0 : i32
    %c0_i32_0 = arith.constant 0 : i32
    %c0_i32_1 = arith.constant 0 : i32
    return %c0_i32, %c0_i32_0 : i32, i32
  }
  func.func @transform_6(%arg0: i32) -> (i32, i32) {
    %c0_i32 = arith.constant 0 : i32
    %c0_i32_0 = arith.constant 0 : i32
    %c0_i32_1 = arith.constant 0 : i32
    return %c0_i32, %c0_i32_0 : i32, i32
  }
  func.func @transform_7(%arg0: i32) -> (i32, i32) {
    %c0_i32 = arith.constant 0 : i32
    %c0_i32_0 = arith.constant 0 : i32
    return %arg0, %c0_i32 : i32, i32
  }
}

</mosaic_0001>

<bundles_post_ra>
// kernel: dqn_forward.1
= control target key start
LH: loop header
LB: loop body
LE: loop exit
PB: predicated region body
PF: predicated region fallthrough
CT: control target
= control target key end

     0   :  { %vm40_vm0 = vcmask 1041408   ;;  %vm36_vm1 = vcmask 31744   ;;  %vm221_vm2 = vcmask 64512   ;;  %s417_s1 = inlined_call_operand.vmem [shape: bf16[4,128], index: 1, kind: input, shape index: {}]   ;;  %s418_s0 = inlined_call_operand.vmem [shape: f32[8,4], index: 0, kind: input, shape index: {}]   ;;  %s419_s3 = inlined_call_operand.vmem [shape: bf16[128,128], index: 3, kind: input, shape index: {}]   ;;  %s420_s2 = inlined_call_operand.vmem [shape: f32[1,128], index: 2, kind: input, shape index: {}]   ;;  %s421_s4 = inlined_call_operand.vmem [shape: f32[1,128], index: 4, kind: input, shape index: {}]   ;;  %s422_s5 = inlined_call_operand.vmem [shape: bf16[128,8], index: 5, kind: input, shape index: {}]   ;;  %s423_s6 = inlined_call_operand.vmem [shape: f32[1,8], index: 6, kind: input, shape index: {}]   ;;  %s424_s7 = inlined_call_operand.vmem [shape: f32[8,8], index: 7, kind: output, shape index: {}]  }
   0x1   :  { %v32_v0 = vld [vmem:[%s417_s1] sm:$0x3]  ;;  %v299_v2 = vld [vmem:[%s419_s3 + $0x38] sm:$0xff]  ;;  %v298_v5 = vld [vmem:[%s419_s3 + $0x30] sm:$0xff] }
   0x2   :  { %v30_v1 = vld [vmem:[%s418_s0] sm:$0xff]  ;;  %v42_v3 = vsel %vm40_vm0, %v32_v0, 0  ;;  %126 = vmatpush.bf16.msra.mxu1 %v299_v2  ;;  %v297_v6 = vld [vmem:[%s419_s3 + $0x28] sm:$0xff]  ;;  %v295_v8 = vld [vmem:[%s419_s3 + $0x18] sm:$0xff] }
   0x3   :  { %v31_v4 = vpack.c.bf16 %v30_v1, %v30_v1  ;;  %51 = vmatpush.bf16.msra.mxu0 %v42_v3  ;;  %v296_v7 = vld [vmem:[%s419_s3 + $0x20] sm:$0xff]  ;;  %v294_v9 = vld [vmem:[%s419_s3 + $0x10] sm:$0xff]  ;;  %v293_v10 = vld [vmem:[%s419_s3 + $0x8] sm:$0xff] }
   0x4   :  { %v292_v11 = vld [vmem:[%s419_s3] sm:$0xff]  ;;  %v307_v12 = vld [vmem:[%s422_s5 + $0x38] sm:$0xff]  ;;  %v306_v13 = vld [vmem:[%s422_s5 + $0x30] sm:$0xff] }
   0x5   :  { %208 = vmatpush.bf16.msra.mxu2 %v307_v12  ;;  %v305_v14 = vld [vmem:[%s422_s5 + $0x28] sm:$0xff]  ;;  %v304_v15 = vld [vmem:[%s422_s5 + $0x20] sm:$0xff]  ;;  %v303_v16 = vld [vmem:[%s422_s5 + $0x18] sm:$0xff] }
   0x6   :  { %227 = vmatmul.msk.bf16.vlgmr.msra.gmra.mxu0 %vm36_vm1, %v31_v4  ;;  %127 = vmatpush.bf16.msra.mxu1 %v298_v5  ;;  %v302_v17 = vld [vmem:[%s422_s5 + $0x10] sm:$0xff]  ;;  %v308_v18 = vld [vmem:[%s420_s2] ss:$0 sm:$0xff]  ;;  %v301_v24 = vld [vmem:[%s422_s5 + $0x8] sm:$0xff] }
   0x7   :  { %v300_v25 = vld [vmem:[%s422_s5] sm:$0xff] }
   0x8   :  { %v309_v26 = vld [vmem:[%s421_s4] ss:$0 sm:$0xff] }
   0x9   :  { %209 = vmatpush.bf16.msra.mxu2 %v306_v13  ;;  %v310_v32 = vld [vmem:[%s423_s6] ss:$0 sm:$0xff] }
   0xa   :  { %128 = vmatpush.bf16.msra.mxu1 %v297_v6 }
   0xd   :  { %210 = vmatpush.bf16.msra.mxu2 %v305_v14 }
   0xe   :  { %129 = vmatpush.bf16.msra.mxu1 %v296_v7 }
  0x11   :  { %211 = vmatpush.bf16.msra.mxu2 %v304_v15 }
  0x12   :  { %130 = vmatpush.bf16.msra.mxu1 %v295_v8 }
  0x15   :  { %212 = vmatpush.bf16.msra.mxu2 %v303_v16 }
  0x16   :  { %131 = vmatpush.bf16.msra.mxu1 %v294_v9 }
  0x19   :  { %213 = vmatpush.bf16.msra.mxu2 %v302_v17 }
  0x1a   :  { %132 = vmatpush.bf16.msra.mxu1 %v293_v10 }
  0x1d   :  { %214 = vmatpush.bf16.msra.mxu2 %v301_v24 }
  0x1e   :  { %133 = vmatpush.bf16.msra.mxu1 %v292_v11 }
  0x21   :  { %215 = vmatpush.bf16.msra.mxu2 %v300_v25 }
  0x83   :  { %v53_v19 = vpop.f32.mrf.mxu0 }
  0x84   :  { %v54_v20 = vadd.f32 %v308_v18, %v53_v19 }
  0x86   :  { %v57_v21 = vmax.f32 %v54_v20, 0.0 }
  0x88   :  { %v58_v22 = vpack.c.bf16 %v57_v21, %v57_v21 }
  0x8a   :  { %134 = vmatmul.bf16.vlgmr.msra.gmra.mxu1 %v58_v22 }
  0x8b   :  { %v55_v23 = vpop.f32.mrf.mxu0 }
 0x107   :  { %v135_v27 = vpop.f32.mrf.mxu1 }
 0x108   :  { %v136_v28 = vadd.f32 %v309_v26, %v135_v27 }
 0x10a   :  { %v139_v29 = vmax.f32 %v136_v28, 0.0 }
 0x10c   :  { %v140_v30 = vpack.c.bf16 %v139_v29, %v139_v29 }
 0x10e   :  { %216 = vmatmul.bf16.vlgmr.msra.gmra.mxu2 %v140_v30 }
 0x10f   :  { %v137_v31 = vpop.f32.mrf.mxu1 }
 0x191   :  { %v217_v33 = vpop.f32.mrf.mxu2 }
 0x192   :  { %v218_v34 = vadd.f32 %v310_v32, %v217_v33 }
 0x194   :  { %222 = vst.msk [vmem:[%s424_s7] sm:$0xff] %vm221_vm2, %v218_v34 }
 0x199   :  { %v219_v35 = vpop.f32.mrf.mxu2 }

</bundles_post_ra>
